<compile_context>
chip_gen: v7x
topology: tpu7x:2x2x1
jax: 0.10.0
libtpu: 0.0.40
codegen_flags: <defaults>
</compile_context>

<pallas_src>
import jax
import jax.numpy as jnp
from jax.experimental import pallas as pl
from jax.experimental.pallas import tpu as pltpu


def _mlp_kernel(x_ref,
                w1_ref, b1_ref,
                w2_ref, b2_ref,
                w3_ref, b3_ref,
                w4_ref, b4_ref,
                o_ref):
    # f32 end-to-end; dropout(p=0.5) is identity at inference.
    h = x_ref[...]

    # fc1 + ReLU
    h = jnp.dot(h, w1_ref[...], preferred_element_type=jnp.float32) + b1_ref[...]
    h = jnp.maximum(h, 0.0)

    # fc2 + ReLU
    h = jnp.dot(h, w2_ref[...], preferred_element_type=jnp.float32) + b2_ref[...]
    h = jnp.maximum(h, 0.0)

    # fc3 + ReLU
    h = jnp.dot(h, w3_ref[...], preferred_element_type=jnp.float32) + b3_ref[...]
    h = jnp.maximum(h, 0.0)

    # output layer + exact Sigmoid
    h = jnp.dot(h, w4_ref[...], preferred_element_type=jnp.float32) + b4_ref[...]
    o_ref[...] = (1.0 / (1.0 + jnp.exp(-h))).astype(o_ref.dtype)


def _round_up(v, m):
    return ((v + m - 1) // m) * m


def neuralnet_forward(x, params, *, block_rows=4096):
    """Fused forward pass of the whole MLP, batch-tiled over a 1-D grid.

    x: (B, input_size) float32
    params: dict with w1..w4 (in, out) f32 and b1..b4 (1, out) f32
    """
    w1, b1 = params["w1"], params["b1"]
    w2, b2 = params["w2"], params["b2"]
    w3, b3 = params["w3"], params["b3"]
    w4, b4 = params["w4"], params["b4"]

    B, in_size = x.shape
    h1, h2, h3 = w1.shape[1], w2.shape[1], w3.shape[1]
    out_size = w4.shape[1]

    block_rows = max(8, _round_up(int(block_rows), 8))

    # Pad only to the next multiple of 8 (f32 sublane); at most 7 extra rows.
    padded_b = _round_up(B, 8)
    x_in = x if padded_b == B else jnp.pad(x, ((0, padded_b - B), (0, 0)))

    if padded_b <= block_rows:
        # Whole batch fits in one block: split into two so the 'parallel'
        # batch axis can shard across both TensorCores on v7x.
        tb = padded_b if padded_b <= 8 else _round_up(pl.cdiv(padded_b, 2), 8)
    else:
        tb = block_rows
    # Last block may be partial; Pallas masks OOB reads/writes.
    grid = (pl.cdiv(padded_b, tb),)

    # Activation tiles march down the batch; weights/biases use constant
    # index maps so they are DMA'd once and stay resident in VMEM.
    def row_spec(feat):
        return pl.BlockSpec((tb, feat), lambda i: (i, 0))

    def const_spec(a):
        nd = a.ndim
        return pl.BlockSpec(a.shape, lambda i, _nd=nd: (0,) * _nd)

    layer_flops = (w1.shape[0] * w1.shape[1] + w2.shape[0] * w2.shape[1]
                   + w3.shape[0] * w3.shape[1] + w4.shape[0] * w4.shape[1])
    flops = 2 * padded_b * layer_flops
    weight_bytes = sum(a.size * 4 for a in (w1, b1, w2, b2, w3, b3, w4, b4))
    bytes_accessed = x_in.size * 4 + weight_bytes + padded_b * out_size * 4

    # Rough VMEM footprint: double-buffered in/out tiles + resident weights
    # + live hidden activations.  Only set an explicit limit when it would
    # exceed the v5e 16 MiB scoped default.
    vmem_need = (weight_bytes
                 + 4 * tb * (2 * in_size + 2 * out_size + h1 + h2 + h3)
                 + (1 << 20))
    cp_kwargs = dict(dimension_semantics=("parallel",))
    if vmem_need > (16 << 20):
        cp_kwargs["vmem_limit_bytes"] = int(vmem_need)

    out = pl.pallas_call(
        _mlp_kernel,
        out_shape=jax.ShapeDtypeStruct((padded_b, out_size), jnp.float32),
        grid_spec=pltpu.PrefetchScalarGridSpec(
            num_scalar_prefetch=0,
            grid=grid,
            in_specs=[row_spec(in_size),
                      const_spec(w1), const_spec(b1),
                      const_spec(w2), const_spec(b2),
                      const_spec(w3), const_spec(b3),
                      const_spec(w4), const_spec(b4)],
            out_specs=pl.BlockSpec((tb, out_size), lambda i: (i, 0)),
        ),
        compiler_params=pltpu.CompilerParams(**cp_kwargs),
        cost_estimate=pl.CostEstimate(
            flops=flops,
            transcendentals=padded_b * out_size,
            bytes_accessed=bytes_accessed),
    )(x_in, w1, b1, w2, b2, w3, b3, w4, b4)

    return out[:B] if padded_b != B else out


def init_params(key, input_size, hidden1, hidden2, hidden3, output_size):
    """Deterministic init mimicking PyTorch nn.Linear default (U(+/- 1/sqrt(fan_in)))."""
    dims = [(input_size, hidden1), (hidden1, hidden2),
            (hidden2, hidden3), (hidden3, output_size)]
    params = {}
    keys = jax.random.split(key, 2 * len(dims))
    for i, (fan_in, fan_out) in enumerate(dims):
        bound = 1.0 / jnp.sqrt(jnp.float32(fan_in))
        w = jax.random.uniform(keys[2 * i], (fan_in, fan_out),
                               minval=-bound, maxval=bound, dtype=jnp.float32)
        b = jax.random.uniform(keys[2 * i + 1], (1, fan_out),
                               minval=-bound, maxval=bound, dtype=jnp.float32)
        params[f"w{i + 1}"] = w
        params[f"b{i + 1}"] = b
    return params


if __name__ == "__main__":
    key = jax.random.PRNGKey(0)
    k_x, k_x2, k_p = jax.random.split(key, 3)

    input_size, hidden1, hidden2, hidden3, output_size = 32, 64, 64, 32, 8
    params = init_params(k_p, input_size, hidden1, hidden2, hidden3, output_size)

    def reference(xv):
        h = xv
        for i in range(1, 4):
            h = jnp.maximum(h @ params[f"w{i}"] + params[f"b{i}"], 0.0)
        return jax.nn.sigmoid(h @ params["w4"] + params["b4"])

    # Tolerance covers only the (possibly different) default f32 matmul
    # precision modes of Mosaic vs XLA; no bf16 casts / approx ops remain.
    tol = 2e-3

    # Small batch: single grid step.
    batch = 8
    x = jax.random.normal(k_x, (batch, input_size), dtype=jnp.float32)
    out = jax.block_until_ready(neuralnet_forward(x, params))
    ref = reference(x)
    assert out.shape == (batch, output_size)
    assert jnp.allclose(out, ref, atol=tol, rtol=tol), (
        float(jnp.max(jnp.abs(out - ref))))

    # Odd batch: exercises pad-to-8, >=2 grid blocks (v7x path) and a partial
    # last block handled by Pallas masking.
    batch2 = 100
    x2 = jax.random.normal(k_x2, (batch2, input_size), dtype=jnp.float32)
    out2 = jax.block_until_ready(neuralnet_forward(x2, params))
    ref2 = reference(x2)
    assert out2.shape == (batch2, output_size)
    assert jnp.allclose(out2, ref2, atol=tol, rtol=tol), (
        float(jnp.max(jnp.abs(out2 - ref2))))

    print("KERNEL_OK")
</pallas_src>

<mosaic_0001>
module attributes {stable_mosaic.version = 11 : i64} {
  func.func @_mlp_kernel(%arg0: i32, %arg1: memref<8x32xf32, #tpu.memory_space<vmem>>, %arg2: memref<32x64xf32, #tpu.memory_space<vmem>>, %arg3: memref<1x64xf32, #tpu.memory_space<vmem>>, %arg4: memref<64x64xf32, #tpu.memory_space<vmem>>, %arg5: memref<1x64xf32, #tpu.memory_space<vmem>>, %arg6: memref<64x32xf32, #tpu.memory_space<vmem>>, %arg7: memref<1x32xf32, #tpu.memory_space<vmem>>, %arg8: memref<32x8xf32, #tpu.memory_space<vmem>>, %arg9: memref<1x8xf32, #tpu.memory_space<vmem>>, %arg10: memref<8x8xf32, #tpu.memory_space<vmem>>) attributes {dimension_semantics = [#tpu.dimension_semantics<parallel>], iteration_bounds = array<i64: 1>, scalar_prefetch = 0 : i64, scratch_operands = 0 : i64, tpu.core_type = #tpu.core_type<tc>, window_params = [{transform_indices = @transform_0, window_bounds = array<i64: 8, 32>}, {pipeline_mode = #tpu.pipeline_mode<synchronous>, transform_indices = @transform_1, window_bounds = array<i64: 32, 64>}, {pipeline_mode = #tpu.pipeline_mode<synchronous>, transform_indices = @transform_2, window_bounds = array<i64: 1, 64>}, {pipeline_mode = #tpu.pipeline_mode<synchronous>, transform_indices = @transform_3, window_bounds = array<i64: 64, 64>}, {pipeline_mode = #tpu.pipeline_mode<synchronous>, transform_indices = @transform_4, window_bounds = array<i64: 1, 64>}, {pipeline_mode = #tpu.pipeline_mode<synchronous>, transform_indices = @transform_5, window_bounds = array<i64: 64, 32>}, {pipeline_mode = #tpu.pipeline_mode<synchronous>, transform_indices = @transform_6, window_bounds = array<i64: 1, 32>}, {pipeline_mode = #tpu.pipeline_mode<synchronous>, transform_indices = @transform_7, window_bounds = array<i64: 32, 8>}, {pipeline_mode = #tpu.pipeline_mode<synchronous>, transform_indices = @transform_8, window_bounds = array<i64: 1, 8>}, {transform_indices = @transform_9, window_bounds = array<i64: 8, 8>}]} {
    %c0 = arith.constant 0 : index
    %c0_0 = arith.constant 0 : index
    %0 = vector.load %arg1[%c0, %c0_0] : memref<8x32xf32, #tpu.memory_space<vmem>>, vector<8x32xf32>
    %c0_1 = arith.constant 0 : index
    %c0_2 = arith.constant 0 : index
    %1 = vector.load %arg2[%c0_1, %c0_2] : memref<32x64xf32, #tpu.memory_space<vmem>>, vector<32x64xf32>
    %cst = arith.constant dense<0.000000e+00> : vector<8x64xf32>
    %2 = tpu.matmul %0, %1, %cst {dimension_numbers = #tpu.dot_dimension_numbers<[1], [0], [0], [1], [0, 0, 1, 1], [], []>} : vector<8x32xf32>, vector<32x64xf32>, vector<8x64xf32> -> vector<8x64xf32>
    %c0_3 = arith.constant 0 : index
    %c0_4 = arith.constant 0 : index
    %3 = vector.load %arg3[%c0_3, %c0_4] : memref<1x64xf32, #tpu.memory_space<vmem>>, vector<1x64xf32>
    %4 = vector.broadcast %3 : vector<1x64xf32> to vector<8x64xf32>
    %5 = arith.addf %2, %4 : vector<8x64xf32>
    %cst_5 = arith.constant 0.000000e+00 : f32
    %6 = vector.broadcast %cst_5 : f32 to vector<8x64xf32>
    %7 = arith.maximumf %5, %6 : vector<8x64xf32>
    %c0_6 = arith.constant 0 : index
    %c0_7 = arith.constant 0 : index
    %8 = vector.load %arg4[%c0_6, %c0_7] : memref<64x64xf32, #tpu.memory_space<vmem>>, vector<64x64xf32>
    %cst_8 = arith.constant dense<0.000000e+00> : vector<8x64xf32>
    %9 = tpu.matmul %7, %8, %cst_8 {dimension_numbers = #tpu.dot_dimension_numbers<[1], [0], [0], [1], [0, 0, 1, 1], [], []>} : vector<8x64xf32>, vector<64x64xf32>, vector<8x64xf32> -> vector<8x64xf32>
    %c0_9 = arith.constant 0 : index
    %c0_10 = arith.constant 0 : index
    %10 = vector.load %arg5[%c0_9, %c0_10] : memref<1x64xf32, #tpu.memory_space<vmem>>, vector<1x64xf32>
    %11 = vector.broadcast %10 : vector<1x64xf32> to vector<8x64xf32>
    %12 = arith.addf %9, %11 : vector<8x64xf32>
    %cst_11 = arith.constant 0.000000e+00 : f32
    %13 = vector.broadcast %cst_11 : f32 to vector<8x64xf32>
    %14 = arith.maximumf %12, %13 : vector<8x64xf32>
    %c0_12 = arith.constant 0 : index
    %c0_13 = arith.constant 0 : index
    %15 = vector.load %arg6[%c0_12, %c0_13] : memref<64x32xf32, #tpu.memory_space<vmem>>, vector<64x32xf32>
    %cst_14 = arith.constant dense<0.000000e+00> : vector<8x32xf32>
    %16 = tpu.matmul %14, %15, %cst_14 {dimension_numbers = #tpu.dot_dimension_numbers<[1], [0], [0], [1], [0, 0, 1, 1], [], []>} : vector<8x64xf32>, vector<64x32xf32>, vector<8x32xf32> -> vector<8x32xf32>
    %c0_15 = arith.constant 0 : index
    %c0_16 = arith.constant 0 : index
    %17 = vector.load %arg7[%c0_15, %c0_16] : memref<1x32xf32, #tpu.memory_space<vmem>>, vector<1x32xf32>
    %18 = vector.broadcast %17 : vector<1x32xf32> to vector<8x32xf32>
    %19 = arith.addf %16, %18 : vector<8x32xf32>
    %cst_17 = arith.constant 0.000000e+00 : f32
    %20 = vector.broadcast %cst_17 : f32 to vector<8x32xf32>
    %21 = arith.maximumf %19, %20 : vector<8x32xf32>
    %c0_18 = arith.constant 0 : index
    %c0_19 = arith.constant 0 : index
    %22 = vector.load %arg8[%c0_18, %c0_19] : memref<32x8xf32, #tpu.memory_space<vmem>>, vector<32x8xf32>
    %cst_20 = arith.constant dense<0.000000e+00> : vector<8x8xf32>
    %23 = tpu.matmul %21, %22, %cst_20 {dimension_numbers = #tpu.dot_dimension_numbers<[1], [0], [0], [1], [0, 0, 1, 1], [], []>} : vector<8x32xf32>, vector<32x8xf32>, vector<8x8xf32> -> vector<8x8xf32>
    %c0_21 = arith.constant 0 : index
    %c0_22 = arith.constant 0 : index
    %24 = vector.load %arg9[%c0_21, %c0_22] : memref<1x8xf32, #tpu.memory_space<vmem>>, vector<1x8xf32>
    %25 = vector.broadcast %24 : vector<1x8xf32> to vector<8x8xf32>
    %26 = arith.addf %23, %25 : vector<8x8xf32>
    %cst_23 = arith.constant 0.000000e+00 : f32
    %27 = vector.broadcast %cst_23 : f32 to vector<8x8xf32>
    %28 = arith.subf %27, %26 : vector<8x8xf32>
    %29 = math.exp %28 : vector<8x8xf32>
    %cst_24 = arith.constant 1.000000e+00 : f32
    %30 = vector.broadcast %cst_24 : f32 to vector<8x8xf32>
    %31 = arith.addf %30, %29 : vector<8x8xf32>
    %cst_25 = arith.constant 1.000000e+00 : f32
    %32 = vector.broadcast %cst_25 : f32 to vector<8x8xf32>
    %33 = arith.divf %32, %31 : vector<8x8xf32>
    %c0_26 = arith.constant 0 : index
    %c0_27 = arith.constant 0 : index
    %34 = vector.load %arg10[%c0_26, %c0_27] : memref<8x8xf32, #tpu.memory_space<vmem>>, vector<8x8xf32>
    tpu.vector_store %arg10[%c0_26, %c0_27], %33 {strides = array<i32>} : memref<8x8xf32, #tpu.memory_space<vmem>>, vector<8x8xf32>,
    return
  }
  func.func @transform_0(%arg0: i32) -> (i32, i32) {
    %c0_i32 = arith.constant 0 : i32
    %c0_i32_0 = arith.constant 0 : i32
    return %arg0, %c0_i32 : i32, i32
  }
  func.func @transform_1(%arg0: i32) -> (i32, i32) {
    %c0_i32 = arith.constant 0 : i32
    %c0_i32_0 = arith.constant 0 : i32
    %c0_i32_1 = arith.constant 0 : i32
    return %c0_i32, %c0_i32_0 : i32, i32
  }
  func.func @transform_2(%arg0: i32) -> (i32, i32) {
    %c0_i32 = arith.constant 0 : i32
    %c0_i32_0 = arith.constant 0 : i32
    %c0_i32_1 = arith.constant 0 : i32
    return %c0_i32, %c0_i32_0 : i32, i32
  }
  func.func @transform_3(%arg0: i32) -> (i32, i32) {
    %c0_i32 = arith.constant 0 : i32
    %c0_i32_0 = arith.constant 0 : i32
    %c0_i32_1 = arith.constant 0 : i32
    return %c0_i32, %c0_i32_0 : i32, i32
  }
  func.func @transform_4(%arg0: i32) -> (i32, i32) {
    %c0_i32 = arith.constant 0 : i32
    %c0_i32_0 = arith.constant 0 : i32
    %c0_i32_1 = arith.constant 0 : i32
    return %c0_i32, %c0_i32_0 : i32, i32
  }
  func.func @transform_5(%arg0: i32) -> (i32, i32) {
    %c0_i32 = arith.constant 0 : i32
    %c0_i32_0 = arith.constant 0 : i32
    %c0_i32_1 = arith.constant 0 : i32
    return %c0_i32, %c0_i32_0 : i32, i32
  }
  func.func @transform_6(%arg0: i32) -> (i32, i32) {
    %c0_i32 = arith.constant 0 : i32
    %c0_i32_0 = arith.constant 0 : i32
    %c0_i32_1 = arith.constant 0 : i32
    return %c0_i32, %c0_i32_0 : i32, i32
  }
  func.func @transform_7(%arg0: i32) -> (i32, i32) {
    %c0_i32 = arith.constant 0 : i32
    %c0_i32_0 = arith.constant 0 : i32
    %c0_i32_1 = arith.constant 0 : i32
    return %c0_i32, %c0_i32_0 : i32, i32
  }
  func.func @transform_8(%arg0: i32) -> (i32, i32) {
    %c0_i32 = arith.constant 0 : i32
    %c0_i32_0 = arith.constant 0 : i32
    %c0_i32_1 = arith.constant 0 : i32
    return %c0_i32, %c0_i32_0 : i32, i32
  }
  func.func @transform_9(%arg0: i32) -> (i32, i32) {
    %c0_i32 = arith.constant 0 : i32
    %c0_i32_0 = arith.constant 0 : i32
    return %arg0, %c0_i32 : i32, i32
  }
}

</mosaic_0001>

<bundles_post_ra>
// kernel: tpu_custom_call.1
= control target key start
LH: loop header
LB: loop body
LE: loop exit
PB: predicated region body
PF: predicated region fallthrough
CT: control target
= control target key end

     0   :  { %v569_v3 = vmov 0.0|0.0   ;;  %vm570_vm0 = vmmov 0   ;;  %v571_v6 = vmov 0.0   ;;  %s742_s0 = inlined_call_operand.vmem [shape: f32[8,32], index: 0, kind: input, shape index: {}]   ;;  %s743_s1 = inlined_call_operand.vmem [shape: f32[32,64], index: 1, kind: input, shape index: {}]   ;;  %s744_s2 = inlined_call_operand.vmem [shape: f32[1,64], index: 2, kind: input, shape index: {}]   ;;  %s745_s3 = inlined_call_operand.vmem [shape: f32[64,64], index: 3, kind: input, shape index: {}]   ;;  %s746_s4 = inlined_call_operand.vmem [shape: f32[1,64], index: 4, kind: input, shape index: {}]   ;;  %s747_s5 = inlined_call_operand.vmem [shape: f32[64,32], index: 5, kind: input, shape index: {}]   ;;  %s748_s6 = inlined_call_operand.vmem [shape: f32[1,32], index: 6, kind: input, shape index: {}]   ;;  %s749_s7 = inlined_call_operand.vmem [shape: f32[32,8], index: 7, kind: input, shape index: {}]   ;;  %s750_s8 = inlined_call_operand.vmem [shape: f32[1,8], index: 8, kind: input, shape index: {}]   ;;  %s751_s9 = inlined_call_operand.hbm [shape: f32[8,8], index: 9, kind: output, shape index: {}]  }
   0x1   :  { %v34_v0 = vld [vmem:[%s743_s1] sm:$0xff]  ;;  %v35_v1 = vld [vmem:[%s743_s1 + $0x8] sm:$0xff]  ;;  %v36_v2 = vld [vmem:[%s743_s1 + $0x10] sm:$0xff]  ;;  %501 = vmatprep.subr.bf16.mxu0 %v569_v3  ;;  %449 = vmatprep.mubr.msk.f32.mxu0 %vm570_vm0, %v571_v6 }
   0x2   :  { %v502_v4 = vpack.c.bf16 %v35_v1, %v34_v0  ;;  %v37_v5 = vld [vmem:[%s743_s1 + $0x18] sm:$0xff]  ;;  %v120_v7 = vld [vmem:[%s745_s3] sm:$0xff]  ;;  %507 = vmatprep.subr.bf16.mxu1 %v569_v3  ;;  %v121_v8 = vld [vmem:[%s745_s3 + $0x8] sm:$0xff]  ;;  %468 = vmatprep.mubr.msk.f32.mxu1 %vm570_vm0, %v571_v6 }
   0x3   :  { %v122_v9 = vld [vmem:[%s745_s3 + $0x10] sm:$0xff]  ;;  %v123_v10 = vld [vmem:[%s745_s3 + $0x18] sm:$0xff]  ;;  %v505_v11 = vpack.c.bf16 %v37_v5, %v36_v2  ;;  %v508_v12 = vpack.c.bf16 %v121_v8, %v120_v7 }
   0x4   :  { %503 = vmatpush3.bf16.msra.mxu0 %v502_v4 }
   0x5   :  { %504 = vmatprep.subr.bf16.mxu0 %v569_v3 }
   0x6   :  { %14 = vsyncpa [#allocation3], 0  ;;  %509 = vmatpush3.bf16.msra.mxu1 %v508_v12  ;;  %v511_v13 = vpack.c.bf16 %v123_v10, %v122_v9  ;;  %v124_v14 = vld [vmem:[%s745_s3 + $0x20] sm:$0xff]  ;;  %v125_v15 = vld [vmem:[%s745_s3 + $0x28] sm:$0xff]  ;;  %vm45_vm1 = vcmask 261120   ;;  %vm135_vm2 = vcmask 523264  }
   0x7   :  { %510 = vmatprep.subr.bf16.mxu1 %v569_v3  ;;  %v33_v16 = vld [vmem:[%s742_s0] sm:$0xff]  ;;  %v514_v17 = vpack.c.bf16 %v125_v15, %v124_v14  ;;  %v126_v18 = vld [vmem:[%s745_s3 + $0x30] sm:$0xff]  ;;  %v127_v19 = vld [vmem:[%s745_s3 + $0x38] sm:$0xff]  ;;  %vm389_vm3 = vcmask 64512  }
   0x8   :  { %506 = vmatpush3.bf16.msra.mxu0 %v505_v11  ;;  %v517_v20 = vpack.c.bf16 %v127_v19, %v126_v18  ;;  %v210_v21 = vld [vmem:[%s747_s5] sm:$0xff]  ;;  %v211_v22 = vld [vmem:[%s747_s5 + $0x8] sm:$0xff]  ;;  %v212_v23 = vld [vmem:[%s747_s5 + $0x10] sm:$0xff] }
   0x9   :  { %519 = vmatprep.subr.bf16.mxu0 %v569_v3  ;;  %v520_v24 = vpack.c.bf16 %v211_v22, %v210_v21  ;;  %v213_v25 = vld [vmem:[%s747_s5 + $0x18] sm:$0xff]  ;;  %v214_v27 = vld [vmem:[%s747_s5 + $0x20] sm:$0xff]  ;;  %v215_v28 = vld [vmem:[%s747_s5 + $0x28] sm:$0xff] }
   0xa   :  { %512 = vmatpush3.bf16.msra.mxu1 %v511_v13  ;;  %v523_v26 = vpack.c.bf16 %v213_v25, %v212_v23  ;;  %v526_v29 = vpack.c.bf16 %v215_v28, %v214_v27  ;;  %v405_v30 = vld [vmem:[%s744_s2] ss:$0 sm:$0xff]  ;;  %v216_v35 = vld [vmem:[%s747_s5 + $0x30] sm:$0xff]  ;;  %v217_v36 = vld [vmem:[%s747_s5 + $0x38] sm:$0xff] }
   0xb   :  { %450 = vmatmul.mubr.msk.f32.vlgmr.msra.gmra.mrb[0].mxu0 %vm45_vm1, %v33_v16  ;;  %513 = vmatprep.subr.bf16.mxu1 %v569_v3  ;;  %v529_v37 = vpack.c.bf16 %v217_v36, %v216_v35  ;;  %v299_v38 = vld [vmem:[%s749_s7] sm:$0xff]  ;;  %v300_v39 = vld [vmem:[%s749_s7 + $0x8] sm:$0xff]  ;;  %v301_v46 = vld [vmem:[%s749_s7 + $0x10] sm:$0xff] }
   0xc   :  { %487 = vmatprep.mubr.msk.f32.mxu0 %vm570_vm0, %v571_v6  ;;  %521 = vmatpush3.bf16.msra.mxu0 %v520_v24  ;;  %v532_v40 = vpack.c.bf16 %v300_v39, %v299_v38  ;;  %v407_v41 = vld [vmem:[%s746_s4] ss:$0 sm:$0xff]  ;;  %v302_v47 = vld [vmem:[%s749_s7 + $0x18] sm:$0xff] }
   0xd   :  { %522 = vmatprep.subr.bf16.mxu0 %v569_v3  ;;  %v535_v48 = vpack.c.bf16 %v302_v47, %v301_v46  ;;  %v409_v49 = vld [vmem:[%s748_s6] ss:$0 sm:$0xff]  ;;  %s572_s6 = smov [#allocation2]  }
   0xe   :  { %515 = vmatpush3.bf16.msra.mxu1 %v514_v17  ;;  %v411_v54 = vld [vmem:[%s750_s8] ss:$0 sm:$0xff]  ;;  %s397_s7 = sshll.u32 %s572_s6, 4  ;;  %s398_s7 = int_to_ptr.vmem [resolvable:$true] %s397_s7 }
   0xf   :  { %516 = vmatprep.subr.bf16.mxu1 %v569_v3  ;;  %s545_s17 = scalar_lea.vmem %s398_s7, 128  ;;  %p550_p1 = scmp.lt.s32.totalorder %s398_s7, %s398_s7 }
  0x10   :  { %524 = vmatpush3.bf16.msra.mxu0 %v523_v26  ;;  %p546_p0 = scmp.ne.s32.totalorder %s398_s7, %s545_s17  ;;  %p551_p2 = scmp.lt.s32.totalorder %s545_s17, %s545_s17 }
  0x11   :  { %525 = vmatprep.subr.bf16.mxu0 %v569_v3 }
  0x12   :  { %518 = vmatpush3.bf16.msra.mxu1 %v517_v20  ;;  %p552_p3 = por %p551_p2, %p550_p1 }
  0x13   :  { %531 = vmatprep.subr.bf16.mxu1 %v569_v3 }
  0x14   :  { %527 = vmatpush3.bf16.msra.mxu0 %v526_v29  ;;  %p553_p4 = pnand %p552_p3, %p546_p0 }
  0x15   :  { %528 = vmatprep.subr.bf16.mxu0 %v569_v3 }
  0x18   :  { %530 = vmatpush3.bf16.msra.mxu0 %v529_v37 }
  0xde   :  { %v115_v31 = vpop.f32.mrb[0].mxu0 }
  0xdf   :  { %v116_v32 = vadd.f32 %v405_v30, %v115_v31  ;;  %v451_v33 = vpop.f32.mrb[1].mxu0 }
  0xe1   :  { %v119_v34 = vmax.f32 %v116_v32, 0.0 }
  0xe3   :  { %469 = vmatmul.mubr.msk.f32.vlgmr.msra.gmra.mrb[0].mxu1 %vm135_vm2, %v119_v34 }
  0xe4   :  { %498 = vmatprep.mubr.msk.f32.mxu1 %vm570_vm0, %v571_v6  ;;  %533 = vmatpush3.bf16.msra.mxu1 %v532_v40 }
  0xe5   :  { %534 = vmatprep.subr.bf16.mxu1 %v569_v3 }
  0xe8   :  { %536 = vmatpush3.bf16.msra.mxu1 %v535_v48 }
 0x1b6   :  { %v205_v42 = vpop.f32.mrb[0].mxu1 }
 0x1b7   :  { %v206_v43 = vadd.f32 %v407_v41, %v205_v42  ;;  %v470_v44 = vpop.f32.mrb[1].mxu1 }
 0x1b9   :  { %v209_v45 = vmax.f32 %v206_v43, 0.0 }
 0x1bb   :  { %488 = vmatmul.mubr.msk.f32.vlgmr.msra.gmra.mrb[2].mxu0 %vm135_vm2, %v209_v45 }
 0x28e   :  { %v294_v50 = vpop.f32.mrb[2].mxu0 }
 0x28f   :  { %v295_v51 = vadd.f32 %v409_v49, %v294_v50  ;;  %v489_v52 = vpop.f32.mrb[3].mxu0 }
 0x291   :  { %v298_v53 = vmax.f32 %v295_v51, 0.0 }
 0x293   :  { %499 = vmatmul.mubr.msk.f32.vlgmr.msra.gmra.mrb[2].mxu1 %vm45_vm1, %v298_v53 }
 0x366   :  { %v379_v55 = vpop.f32.mrb[2].mxu1 }
 0x367   :  { %v380_v56 = vadd.f32 %v411_v54, %v379_v55  ;;  %v500_v57 = vpop.f32.mrb[3].mxu1 }
 0x369   :  { %v383_v58 = vsub.f32 0.0, %v380_v56 }
 0x36b   :  { %v384_v59 = vmul.f32 1.442695, %v383_v58 }
 0x36d   :  { %541 = vpow2.f32 %v384_v59 }
 0x377   :  { %v542_v60 = vpop.eup %541 }
 0x378   :  { %v386_v61 = vadd.f32 1.0, %v542_v60 }
 0x37a   :  { %543 = vrcp.f32 %v386_v61 }
 0x384   :  { %v544_v62 = vpop.eup %543 }
 0x385   :  { %390 = vst.msk [vmem:[#allocation2] sm:$0xff] %vm389_vm3, %v544_v62 }
 0x386   :  { %556 = shalt.err (!%p553_p4)
}
 0x387   :  { %s557_s19 = scalar_lea.hbm %s751_s9, 128 }
 0x388   :  { %p558_p5 = scmp.ne.s32.totalorder %s751_s9, %s557_s19  ;;  %p561_p6 = scmp.lt.u32.totalorder %s557_s19, %s751_s9 }
 0x38a   :  { %p563_p7 = pnand %p561_p6, %p558_p5 }
 0x38c   :  { %566 = shalt.err (!%p563_p7)
}
 0x38d   :  { %400 = dma.vmem_to_hbm [thread:$0]  %s398_s7, 128, %s751_s9, [#allocation3]  }
 0x38e   :  { %567 = dma.done.wait [#allocation3], 128  }
 0x38f   :  { %568 = vsyncadd [#allocation3], 4294967168 }
 0x390   :  { %404 = vsyncpa [#allocation3], 1 }

</bundles_post_ra>
